<compile_context>
chip_gen: v7x
topology: tpu7x:2x2x1
jax: 0.10.0
libtpu: 0.0.40
codegen_flags: <defaults>
</compile_context>

<pallas_src>
import math
import numpy as np

import jax
import jax.numpy as jnp
from jax import lax
from jax.experimental import pallas as pl
from jax.experimental.pallas import tpu as pltpu


# ----------------------------------------------------------------------------
# Fused multi-head attention kernel (one grid step = one batch element)
# ----------------------------------------------------------------------------
def _make_fused_mha_kernel(H, d_k, scale):
    BIG = 1e30  # finite large-negative mask bias (avoids exp(-inf) NaN traps)

    def kernel(q_ref, k_ref, v_ref, m_ref,
               wq_ref, bq_ref, wk_ref, bk_ref, wv_ref, bv_ref,
               wo_ref, bo_ref, o_ref):
        # Blocks (per batch element b):
        #   q: (1, Sq, Dq)   k: (1, Sk, Dk)   v: (1, Sk, Dv)   m: (1, 1, Sk)
        #   wq: (Dq, dm) bq: (1, dm)   wk: (Dk, dm) bk: (1, dm)
        #   wv: (Dv, dm) bv: (1, dm)   wo: (dm, Dq) bo: (1, Dq)
        #   o: (1, Sq, Dq)
        q = q_ref[0]            # (Sq, Dq)
        k = k_ref[0]            # (Sk, Dk)
        v = v_ref[0]            # (Sk, Dv)
        m = m_ref[0]            # (1, Sk)

        # Input projections (weights already (Din, Dout): no transpose here).
        qd = jnp.dot(q, wq_ref[...], preferred_element_type=jnp.float32) + bq_ref[...]
        kd = jnp.dot(k, wk_ref[...], preferred_element_type=jnp.float32) + bk_ref[...]
        vd = jnp.dot(v, wv_ref[...], preferred_element_type=jnp.float32) + bv_ref[...]

        # Additive mask bias: 0 where mask==1, -1e30 where mask==0.
        bias = (m - 1.0) * BIG                      # (1, Sk), broadcasts over Sq

        Sq = q.shape[0]
        Dq = wo_ref.shape[1]
        acc = jnp.zeros((Sq, Dq), jnp.float32)      # merged-heads @ W_out accumulator

        # Per-head attention; head split/merge are static lane slices, the
        # merge + output projection are fused into the accumulation below.
        for h in range(H):
            lo = h * d_k
            qh = qd[:, lo:lo + d_k]                 # (Sq, d_k)
            kh = kd[:, lo:lo + d_k]                 # (Sk, d_k)
            vh = vd[:, lo:lo + d_k]                 # (Sk, d_k)

            # scores = qh @ kh^T via dot_general contracting the last dims
            # (no explicit transpose of kh).
            s = lax.dot_general(qh, kh, (((1,), (1,)), ((), ())),
                                preferred_element_type=jnp.float32) * scale
            s = s + bias                            # (Sq, Sk)

            s_max = jnp.max(s, axis=-1, keepdims=True)
            p = jnp.exp(s - s_max)
            denom = jnp.sum(p, axis=-1, keepdims=True)

            # Unnormalized p @ v, then normalize the small (Sq, d_k) output
            # with an EUP approximate reciprocal (deferred normalization).
            oh = jnp.dot(p, vh, preferred_element_type=jnp.float32)
            oh = oh * pl.reciprocal(denom, approx=True)

            # Head-merge fused into the output projection: oh @ W_out[rows of h].
            acc = acc + jnp.dot(oh, wo_ref[lo:lo + d_k, :],
                                preferred_element_type=jnp.float32)

        o_ref[0] = (acc + bo_ref[...]).astype(o_ref.dtype)

    return kernel


# ----------------------------------------------------------------------------
# MultiheadedAttention forward (single fused pallas_call)
# ----------------------------------------------------------------------------
def multiheaded_attention_forward(params, Q, K, V, mask, H):
    B, Sq, Dq = Q.shape
    _, Sk, Dk = K.shape
    Dv = V.shape[2]
    d_model = params["W_Q2d"].shape[0]
    d_k = d_model // H
    scale = 1.0 / math.sqrt(d_k)

    # Pre-transpose weights once to (Din, Dout); reshape biases to 2-D rows.
    wq = params["W_Q2d"].T      # (Dq, d_model)
    wk = params["W_K2d"].T      # (Dk, d_model)
    wv = params["W_V2d"].T      # (Dv, d_model)
    wo = params["W_d2Q"].T      # (d_model, Dq)
    bq = params["b_Q2d"].reshape(1, d_model)
    bk = params["b_K2d"].reshape(1, d_model)
    bv = params["b_V2d"].reshape(1, d_model)
    bo = params["b_d2Q"].reshape(1, Dq)

    kernel = _make_fused_mha_kernel(H, d_k, scale)

    flops = 2 * B * (Sq * Dq * d_model + Sk * Dk * d_model + Sk * Dv * d_model
                     + 2 * H * Sq * Sk * d_k + Sq * d_model * Dq)
    transcendentals = B * H * Sq * (Sk + 1)   # exp + reciprocal
    bytes_accessed = 4 * int(Q.size + K.size + V.size + mask.size
                             + wq.size + wk.size + wv.size + wo.size
                             + bq.size + bk.size + bv.size + bo.size
                             + B * Sq * Dq)

    const = lambda b: (0, 0)   # weights/biases stay resident in VMEM across grid

    return pl.pallas_call(
        kernel,
        out_shape=jax.ShapeDtypeStruct((B, Sq, Dq), jnp.float32),
        grid_spec=pltpu.PrefetchScalarGridSpec(
            num_scalar_prefetch=0,
            grid=(B,),
            in_specs=[
                pl.BlockSpec((1, Sq, Dq), lambda b: (b, 0, 0)),
                pl.BlockSpec((1, Sk, Dk), lambda b: (b, 0, 0)),
                pl.BlockSpec((1, Sk, Dv), lambda b: (b, 0, 0)),
                pl.BlockSpec((1, 1, Sk), lambda b: (b, 0, 0)),
                pl.BlockSpec((Dq, d_model), const),
                pl.BlockSpec((1, d_model), const),
                pl.BlockSpec((Dk, d_model), const),
                pl.BlockSpec((1, d_model), const),
                pl.BlockSpec((Dv, d_model), const),
                pl.BlockSpec((1, d_model), const),
                pl.BlockSpec((d_model, Dq), const),
                pl.BlockSpec((1, Dq), const),
            ],
            out_specs=pl.BlockSpec((1, Sq, Dq), lambda b: (b, 0, 0)),
        ),
        compiler_params=pltpu.CompilerParams(
            dimension_semantics=("parallel",),
            vmem_limit_bytes=48 * 1024 * 1024,
        ),
        cost_estimate=pl.CostEstimate(
            flops=flops,
            transcendentals=transcendentals,
            bytes_accessed=bytes_accessed,
        ),
    )(Q, K, V, mask, wq, bq, wk, bk, wv, bv, wo, bo)


# ----------------------------------------------------------------------------
# Pure-JAX reference (mirrors the PyTorch module exactly)
# ----------------------------------------------------------------------------
def _reference_forward(params, Q, K, V, mask, H):
    B, Sq, _ = Q.shape
    Sk = K.shape[1]
    d_model = params["W_Q2d"].shape[0]
    d_k = d_model // H

    Qd = Q @ params["W_Q2d"].T + params["b_Q2d"]
    Kd = K @ params["W_K2d"].T + params["b_K2d"]
    Vd = V @ params["W_V2d"].T + params["b_V2d"]

    Qh = Qd.reshape(B, Sq, H, d_k).transpose(0, 2, 1, 3)
    Kh = Kd.reshape(B, Sk, H, d_k).transpose(0, 2, 1, 3)
    Vh = Vd.reshape(B, Sk, H, d_k).transpose(0, 2, 1, 3)

    s = jnp.einsum("bhqd,bhkd->bhqk", Qh, Kh) / np.sqrt(d_k)
    m = mask[:, None, :, :]  # (B,1,1,Sk)
    s = jnp.where(m == 0, -jnp.inf, s)
    p = jax.nn.softmax(s, axis=-1)
    Oh = jnp.einsum("bhqk,bhkd->bhqd", p, Vh)

    O = Oh.transpose(0, 2, 1, 3).reshape(B, Sq, d_model)
    return O @ params["W_d2Q"].T + params["b_d2Q"]


# ----------------------------------------------------------------------------
# Deterministic parameter init (PyTorch nn.Linear-style uniform)
# ----------------------------------------------------------------------------
def _init_linear(key, d_out, d_in):
    kw, kb = jax.random.split(key)
    bound = 1.0 / math.sqrt(d_in)
    w = jax.random.uniform(kw, (d_out, d_in), jnp.float32, -bound, bound)
    b = jax.random.uniform(kb, (d_out,), jnp.float32, -bound, bound)
    return w, b


if __name__ == "__main__":
    # Small shapes consistent with the module's forward:
    B, Sq, Sk = 2, 8, 8
    d_model_Q, d_model_K, d_model_V = 32, 24, 24
    H = 4
    d_model = d_model_Q  # d_model=None branch -> d_model = d_model_Q
    assert d_model % H == 0

    root = jax.random.PRNGKey(0)
    kq, kk, kv, k1, k2, k3, k4, km = jax.random.split(root, 8)

    W_Q2d, b_Q2d = _init_linear(k1, d_model, d_model_Q)
    W_K2d, b_K2d = _init_linear(k2, d_model, d_model_K)
    W_V2d, b_V2d = _init_linear(k3, d_model, d_model_V)
    W_d2Q, b_d2Q = _init_linear(k4, d_model_Q, d_model)
    params = dict(
        W_Q2d=W_Q2d, b_Q2d=b_Q2d,
        W_K2d=W_K2d, b_K2d=b_K2d,
        W_V2d=W_V2d, b_V2d=b_V2d,
        W_d2Q=W_d2Q, b_d2Q=b_d2Q,
    )

    Q = jax.random.normal(kq, (B, Sq, d_model_Q), jnp.float32)
    K = jax.random.normal(kk, (B, Sk, d_model_K), jnp.float32)
    V = jax.random.normal(kv, (B, Sk, d_model_V), jnp.float32)

    # Padding-style mask (B, 1, Sk): keep first `len` keys per batch element.
    lens = jnp.array([Sk, Sk - 3], dtype=jnp.int32)
    mask = (jnp.arange(Sk)[None, :] < lens[:, None]).astype(jnp.float32)[:, None, :]

    out = multiheaded_attention_forward(params, Q, K, V, mask, H)
    out = jax.block_until_ready(out)

    ref = _reference_forward(params, Q, K, V, mask, H)
    # Loose tolerance only because of pl.reciprocal(approx=True) in the softmax
    # normalization; all other math is exact f32.
    np.testing.assert_allclose(np.asarray(out), np.asarray(ref), rtol=2e-2, atol=2e-2)

    print("KERNEL_OK")
</pallas_src>

<mosaic_0001>
module attributes {stable_mosaic.version = 11 : i64} {
  func.func @kernel(%arg0: i32, %arg1: memref<1x8x32xf32, #tpu.memory_space<vmem>>, %arg2: memref<1x8x24xf32, #tpu.memory_space<vmem>>, %arg3: memref<1x8x24xf32, #tpu.memory_space<vmem>>, %arg4: memref<1x1x8xf32, #tpu.memory_space<vmem>>, %arg5: memref<32x32xf32, #tpu.memory_space<vmem>>, %arg6: memref<1x32xf32, #tpu.memory_space<vmem>>, %arg7: memref<24x32xf32, #tpu.memory_space<vmem>>, %arg8: memref<1x32xf32, #tpu.memory_space<vmem>>, %arg9: memref<24x32xf32, #tpu.memory_space<vmem>>, %arg10: memref<1x32xf32, #tpu.memory_space<vmem>>, %arg11: memref<32x32xf32, #tpu.memory_space<vmem>>, %arg12: memref<1x32xf32, #tpu.memory_space<vmem>>, %arg13: memref<1x8x32xf32, #tpu.memory_space<vmem>>) attributes {dimension_semantics = [#tpu.dimension_semantics<parallel>], iteration_bounds = array<i64: 2>, scalar_prefetch = 0 : i64, scratch_operands = 0 : i64, tpu.core_type = #tpu.core_type<tc>, window_params = [{transform_indices = @transform_0, window_bounds = array<i64: 1, 8, 32>}, {transform_indices = @transform_1, window_bounds = array<i64: 1, 8, 24>}, {transform_indices = @transform_2, window_bounds = array<i64: 1, 8, 24>}, {transform_indices = @transform_3, window_bounds = array<i64: 1, 1, 8>}, {pipeline_mode = #tpu.pipeline_mode<synchronous>, transform_indices = @transform_4, window_bounds = array<i64: 32, 32>}, {pipeline_mode = #tpu.pipeline_mode<synchronous>, transform_indices = @transform_5, window_bounds = array<i64: 1, 32>}, {pipeline_mode = #tpu.pipeline_mode<synchronous>, transform_indices = @transform_6, window_bounds = array<i64: 24, 32>}, {pipeline_mode = #tpu.pipeline_mode<synchronous>, transform_indices = @transform_7, window_bounds = array<i64: 1, 32>}, {pipeline_mode = #tpu.pipeline_mode<synchronous>, transform_indices = @transform_8, window_bounds = array<i64: 24, 32>}, {pipeline_mode = #tpu.pipeline_mode<synchronous>, transform_indices = @transform_9, window_bounds = array<i64: 1, 32>}, {pipeline_mode = #tpu.pipeline_mode<synchronous>, transform_indices = @transform_10, window_bounds = array<i64: 32, 32>}, {pipeline_mode = #tpu.pipeline_mode<synchronous>, transform_indices = @transform_11, window_bounds = array<i64: 1, 32>}, {transform_indices = @transform_12, window_bounds = array<i64: 1, 8, 32>}]} {
    %c0 = arith.constant 0 : index
    %c0_0 = arith.constant 0 : index
    %c0_1 = arith.constant 0 : index
    %0 = vector.load %arg1[%c0, %c0_0, %c0_1] : memref<1x8x32xf32, #tpu.memory_space<vmem>>, vector<1x8x32xf32>
    %1 = vector.shape_cast %0 : vector<1x8x32xf32> to vector<8x32xf32>
    %c0_2 = arith.constant 0 : index
    %c0_3 = arith.constant 0 : index
    %c0_4 = arith.constant 0 : index
    %2 = vector.load %arg2[%c0_2, %c0_3, %c0_4] : memref<1x8x24xf32, #tpu.memory_space<vmem>>, vector<1x8x24xf32>
    %3 = vector.shape_cast %2 : vector<1x8x24xf32> to vector<8x24xf32>
    %c0_5 = arith.constant 0 : index
    %c0_6 = arith.constant 0 : index
    %c0_7 = arith.constant 0 : index
    %4 = vector.load %arg3[%c0_5, %c0_6, %c0_7] : memref<1x8x24xf32, #tpu.memory_space<vmem>>, vector<1x8x24xf32>
    %5 = vector.shape_cast %4 : vector<1x8x24xf32> to vector<8x24xf32>
    %c0_8 = arith.constant 0 : index
    %c0_9 = arith.constant 0 : index
    %c0_10 = arith.constant 0 : index
    %6 = vector.load %arg4[%c0_8, %c0_9, %c0_10] : memref<1x1x8xf32, #tpu.memory_space<vmem>>, vector<1x1x8xf32>
    %7 = vector.shape_cast %6 : vector<1x1x8xf32> to vector<1x8xf32>
    %c0_11 = arith.constant 0 : index
    %c0_12 = arith.constant 0 : index
    %8 = vector.load %arg5[%c0_11, %c0_12] : memref<32x32xf32, #tpu.memory_space<vmem>>, vector<32x32xf32>
    %cst = arith.constant dense<0.000000e+00> : vector<8x32xf32>
    %9 = tpu.matmul %1, %8, %cst {dimension_numbers = #tpu.dot_dimension_numbers<[1], [0], [0], [1], [0, 0, 1, 1], [], []>} : vector<8x32xf32>, vector<32x32xf32>, vector<8x32xf32> -> vector<8x32xf32>
    %c0_13 = arith.constant 0 : index
    %c0_14 = arith.constant 0 : index
    %10 = vector.load %arg6[%c0_13, %c0_14] : memref<1x32xf32, #tpu.memory_space<vmem>>, vector<1x32xf32>
    %11 = vector.broadcast %10 : vector<1x32xf32> to vector<8x32xf32>
    %12 = arith.addf %9, %11 : vector<8x32xf32>
    %c0_15 = arith.constant 0 : index
    %c0_16 = arith.constant 0 : index
    %13 = vector.load %arg7[%c0_15, %c0_16] : memref<24x32xf32, #tpu.memory_space<vmem>>, vector<24x32xf32>
    %cst_17 = arith.constant dense<0.000000e+00> : vector<8x32xf32>
    %14 = tpu.matmul %3, %13, %cst_17 {dimension_numbers = #tpu.dot_dimension_numbers<[1], [0], [0], [1], [0, 0, 1, 1], [], []>} : vector<8x24xf32>, vector<24x32xf32>, vector<8x32xf32> -> vector<8x32xf32>
    %c0_18 = arith.constant 0 : index
    %c0_19 = arith.constant 0 : index
    %15 = vector.load %arg8[%c0_18, %c0_19] : memref<1x32xf32, #tpu.memory_space<vmem>>, vector<1x32xf32>
    %16 = vector.broadcast %15 : vector<1x32xf32> to vector<8x32xf32>
    %17 = arith.addf %14, %16 : vector<8x32xf32>
    %c0_20 = arith.constant 0 : index
    %c0_21 = arith.constant 0 : index
    %18 = vector.load %arg9[%c0_20, %c0_21] : memref<24x32xf32, #tpu.memory_space<vmem>>, vector<24x32xf32>
    %cst_22 = arith.constant dense<0.000000e+00> : vector<8x32xf32>
    %19 = tpu.matmul %5, %18, %cst_22 {dimension_numbers = #tpu.dot_dimension_numbers<[1], [0], [0], [1], [0, 0, 1, 1], [], []>} : vector<8x24xf32>, vector<24x32xf32>, vector<8x32xf32> -> vector<8x32xf32>
    %c0_23 = arith.constant 0 : index
    %c0_24 = arith.constant 0 : index
    %20 = vector.load %arg10[%c0_23, %c0_24] : memref<1x32xf32, #tpu.memory_space<vmem>>, vector<1x32xf32>
    %21 = vector.broadcast %20 : vector<1x32xf32> to vector<8x32xf32>
    %22 = arith.addf %19, %21 : vector<8x32xf32>
    %cst_25 = arith.constant 1.000000e+00 : f32
    %23 = vector.broadcast %cst_25 : f32 to vector<1x8xf32>
    %24 = arith.subf %7, %23 : vector<1x8xf32>
    %cst_26 = arith.constant 1.000000e+30 : f32
    %25 = vector.broadcast %cst_26 : f32 to vector<1x8xf32>
    %26 = arith.mulf %24, %25 : vector<1x8xf32>
    %cst_27 = arith.constant 0.000000e+00 : f32
    %27 = vector.broadcast %cst_27 : f32 to vector<8x32xf32>
    %28 = vector.extract_strided_slice %12 {offsets = [0, 0], sizes = [8, 8], strides = [1, 1]} : vector<8x32xf32> to vector<8x8xf32>
    %29 = vector.extract_strided_slice %17 {offsets = [0, 0], sizes = [8, 8], strides = [1, 1]} : vector<8x32xf32> to vector<8x8xf32>
    %30 = vector.extract_strided_slice %22 {offsets = [0, 0], sizes = [8, 8], strides = [1, 1]} : vector<8x32xf32> to vector<8x8xf32>
    %cst_28 = arith.constant dense<0.000000e+00> : vector<8x8xf32>
    %31 = tpu.matmul %28, %29, %cst_28 {dimension_numbers = #tpu.dot_dimension_numbers<[1], [1], [0], [0], [0, 0, 1, 0], [], []>} : vector<8x8xf32>, vector<8x8xf32>, vector<8x8xf32> -> vector<8x8xf32>
    %cst_29 = arith.constant 0.353553385 : f32
    %32 = vector.broadcast %cst_29 : f32 to vector<8x8xf32>
    %33 = arith.mulf %31, %32 : vector<8x8xf32>
    %34 = vector.broadcast %26 : vector<1x8xf32> to vector<8x8xf32>
    %35 = arith.addf %33, %34 : vector<8x8xf32>
    %cst_30 = arith.constant dense<0xFF800000> : vector<8xf32>
    %36 = vector.multi_reduction <maximumf>, %35, %cst_30 [1] : vector<8x8xf32> to vector<8xf32>
    %37 = vector.shape_cast %36 : vector<8xf32> to vector<8x1xf32>
    %38 = vector.broadcast %37 : vector<8x1xf32> to vector<8x8xf32>
    %39 = arith.subf %35, %38 : vector<8x8xf32>
    %40 = math.exp %39 : vector<8x8xf32>
    %cst_31 = arith.constant dense<0.000000e+00> : vector<8xf32>
    %41 = vector.multi_reduction <add>, %40, %cst_31 [1] : vector<8x8xf32> to vector<8xf32>
    %42 = vector.shape_cast %41 : vector<8xf32> to vector<8x1xf32>
    %cst_32 = arith.constant dense<0.000000e+00> : vector<8x8xf32>
    %43 = tpu.matmul %40, %30, %cst_32 {dimension_numbers = #tpu.dot_dimension_numbers<[1], [0], [0], [1], [0, 0, 1, 1], [], []>} : vector<8x8xf32>, vector<8x8xf32>, vector<8x8xf32> -> vector<8x8xf32>
    %44 = tpu.reciprocal %42 {approx = true} : vector<8x1xf32> -> vector<8x1xf32>
    %45 = vector.broadcast %44 : vector<8x1xf32> to vector<8x8xf32>
    %46 = arith.mulf %43, %45 : vector<8x8xf32>
    %c0_33 = arith.constant 0 : index
    %c0_34 = arith.constant 0 : index
    %47 = vector.load %arg11[%c0_33, %c0_34] : memref<32x32xf32, #tpu.memory_space<vmem>>, vector<8x32xf32>
    %cst_35 = arith.constant dense<0.000000e+00> : vector<8x32xf32>
    %48 = tpu.matmul %46, %47, %cst_35 {dimension_numbers = #tpu.dot_dimension_numbers<[1], [0], [0], [1], [0, 0, 1, 1], [], []>} : vector<8x8xf32>, vector<8x32xf32>, vector<8x32xf32> -> vector<8x32xf32>
    %49 = arith.addf %27, %48 : vector<8x32xf32>
    %50 = vector.extract_strided_slice %12 {offsets = [0, 8], sizes = [8, 8], strides = [1, 1]} : vector<8x32xf32> to vector<8x8xf32>
    %51 = vector.extract_strided_slice %17 {offsets = [0, 8], sizes = [8, 8], strides = [1, 1]} : vector<8x32xf32> to vector<8x8xf32>
    %52 = vector.extract_strided_slice %22 {offsets = [0, 8], sizes = [8, 8], strides = [1, 1]} : vector<8x32xf32> to vector<8x8xf32>
    %cst_36 = arith.constant dense<0.000000e+00> : vector<8x8xf32>
    %53 = tpu.matmul %50, %51, %cst_36 {dimension_numbers = #tpu.dot_dimension_numbers<[1], [1], [0], [0], [0, 0, 1, 0], [], []>} : vector<8x8xf32>, vector<8x8xf32>, vector<8x8xf32> -> vector<8x8xf32>
    %cst_37 = arith.constant 0.353553385 : f32
    %54 = vector.broadcast %cst_37 : f32 to vector<8x8xf32>
    %55 = arith.mulf %53, %54 : vector<8x8xf32>
    %56 = vector.broadcast %26 : vector<1x8xf32> to vector<8x8xf32>
    %57 = arith.addf %55, %56 : vector<8x8xf32>
    %cst_38 = arith.constant dense<0xFF800000> : vector<8xf32>
    %58 = vector.multi_reduction <maximumf>, %57, %cst_38 [1] : vector<8x8xf32> to vector<8xf32>
    %59 = vector.shape_cast %58 : vector<8xf32> to vector<8x1xf32>
    %60 = vector.broadcast %59 : vector<8x1xf32> to vector<8x8xf32>
    %61 = arith.subf %57, %60 : vector<8x8xf32>
    %62 = math.exp %61 : vector<8x8xf32>
    %cst_39 = arith.constant dense<0.000000e+00> : vector<8xf32>
    %63 = vector.multi_reduction <add>, %62, %cst_39 [1] : vector<8x8xf32> to vector<8xf32>
    %64 = vector.shape_cast %63 : vector<8xf32> to vector<8x1xf32>
    %cst_40 = arith.constant dense<0.000000e+00> : vector<8x8xf32>
    %65 = tpu.matmul %62, %52, %cst_40 {dimension_numbers = #tpu.dot_dimension_numbers<[1], [0], [0], [1], [0, 0, 1, 1], [], []>} : vector<8x8xf32>, vector<8x8xf32>, vector<8x8xf32> -> vector<8x8xf32>
    %66 = tpu.reciprocal %64 {approx = true} : vector<8x1xf32> -> vector<8x1xf32>
    %67 = vector.broadcast %66 : vector<8x1xf32> to vector<8x8xf32>
    %68 = arith.mulf %65, %67 : vector<8x8xf32>
    %c8 = arith.constant 8 : index
    %c0_41 = arith.constant 0 : index
    %69 = vector.load %arg11[%c8, %c0_41] : memref<32x32xf32, #tpu.memory_space<vmem>>, vector<8x32xf32>
    %cst_42 = arith.constant dense<0.000000e+00> : vector<8x32xf32>
    %70 = tpu.matmul %68, %69, %cst_42 {dimension_numbers = #tpu.dot_dimension_numbers<[1], [0], [0], [1], [0, 0, 1, 1], [], []>} : vector<8x8xf32>, vector<8x32xf32>, vector<8x32xf32> -> vector<8x32xf32>
    %71 = arith.addf %49, %70 : vector<8x32xf32>
    %72 = vector.extract_strided_slice %12 {offsets = [0, 16], sizes = [8, 8], strides = [1, 1]} : vector<8x32xf32> to vector<8x8xf32>
    %73 = vector.extract_strided_slice %17 {offsets = [0, 16], sizes = [8, 8], strides = [1, 1]} : vector<8x32xf32> to vector<8x8xf32>
    %74 = vector.extract_strided_slice %22 {offsets = [0, 16], sizes = [8, 8], strides = [1, 1]} : vector<8x32xf32> to vector<8x8xf32>
    %cst_43 = arith.constant dense<0.000000e+00> : vector<8x8xf32>
    %75 = tpu.matmul %72, %73, %cst_43 {dimension_numbers = #tpu.dot_dimension_numbers<[1], [1], [0], [0], [0, 0, 1, 0], [], []>} : vector<8x8xf32>, vector<8x8xf32>, vector<8x8xf32> -> vector<8x8xf32>
    %cst_44 = arith.constant 0.353553385 : f32
    %76 = vector.broadcast %cst_44 : f32 to vector<8x8xf32>
    %77 = arith.mulf %75, %76 : vector<8x8xf32>
    %78 = vector.broadcast %26 : vector<1x8xf32> to vector<8x8xf32>
    %79 = arith.addf %77, %78 : vector<8x8xf32>
    %cst_45 = arith.constant dense<0xFF800000> : vector<8xf32>
    %80 = vector.multi_reduction <maximumf>, %79, %cst_45 [1] : vector<8x8xf32> to vector<8xf32>
    %81 = vector.shape_cast %80 : vector<8xf32> to vector<8x1xf32>
    %82 = vector.broadcast %81 : vector<8x1xf32> to vector<8x8xf32>
    %83 = arith.subf %79, %82 : vector<8x8xf32>
    %84 = math.exp %83 : vector<8x8xf32>
    %cst_46 = arith.constant dense<0.000000e+00> : vector<8xf32>
    %85 = vector.multi_reduction <add>, %84, %cst_46 [1] : vector<8x8xf32> to vector<8xf32>
    %86 = vector.shape_cast %85 : vector<8xf32> to vector<8x1xf32>
    %cst_47 = arith.constant dense<0.000000e+00> : vector<8x8xf32>
    %87 = tpu.matmul %84, %74, %cst_47 {dimension_numbers = #tpu.dot_dimension_numbers<[1], [0], [0], [1], [0, 0, 1, 1], [], []>} : vector<8x8xf32>, vector<8x8xf32>, vector<8x8xf32> -> vector<8x8xf32>
    %88 = tpu.reciprocal %86 {approx = true} : vector<8x1xf32> -> vector<8x1xf32>
    %89 = vector.broadcast %88 : vector<8x1xf32> to vector<8x8xf32>
    %90 = arith.mulf %87, %89 : vector<8x8xf32>
    %c16 = arith.constant 16 : index
    %c0_48 = arith.constant 0 : index
    %91 = vector.load %arg11[%c16, %c0_48] : memref<32x32xf32, #tpu.memory_space<vmem>>, vector<8x32xf32>
    %cst_49 = arith.constant dense<0.000000e+00> : vector<8x32xf32>
    %92 = tpu.matmul %90, %91, %cst_49 {dimension_numbers = #tpu.dot_dimension_numbers<[1], [0], [0], [1], [0, 0, 1, 1], [], []>} : vector<8x8xf32>, vector<8x32xf32>, vector<8x32xf32> -> vector<8x32xf32>
    %93 = arith.addf %71, %92 : vector<8x32xf32>
    %94 = vector.extract_strided_slice %12 {offsets = [0, 24], sizes = [8, 8], strides = [1, 1]} : vector<8x32xf32> to vector<8x8xf32>
    %95 = vector.extract_strided_slice %17 {offsets = [0, 24], sizes = [8, 8], strides = [1, 1]} : vector<8x32xf32> to vector<8x8xf32>
    %96 = vector.extract_strided_slice %22 {offsets = [0, 24], sizes = [8, 8], strides = [1, 1]} : vector<8x32xf32> to vector<8x8xf32>
    %cst_50 = arith.constant dense<0.000000e+00> : vector<8x8xf32>
    %97 = tpu.matmul %94, %95, %cst_50 {dimension_numbers = #tpu.dot_dimension_numbers<[1], [1], [0], [0], [0, 0, 1, 0], [], []>} : vector<8x8xf32>, vector<8x8xf32>, vector<8x8xf32> -> vector<8x8xf32>
    %cst_51 = arith.constant 0.353553385 : f32
    %98 = vector.broadcast %cst_51 : f32 to vector<8x8xf32>
    %99 = arith.mulf %97, %98 : vector<8x8xf32>
    %100 = vector.broadcast %26 : vector<1x8xf32> to vector<8x8xf32>
    %101 = arith.addf %99, %100 : vector<8x8xf32>
    %cst_52 = arith.constant dense<0xFF800000> : vector<8xf32>
    %102 = vector.multi_reduction <maximumf>, %101, %cst_52 [1] : vector<8x8xf32> to vector<8xf32>
    %103 = vector.shape_cast %102 : vector<8xf32> to vector<8x1xf32>
    %104 = vector.broadcast %103 : vector<8x1xf32> to vector<8x8xf32>
    %105 = arith.subf %101, %104 : vector<8x8xf32>
    %106 = math.exp %105 : vector<8x8xf32>
    %cst_53 = arith.constant dense<0.000000e+00> : vector<8xf32>
    %107 = vector.multi_reduction <add>, %106, %cst_53 [1] : vector<8x8xf32> to vector<8xf32>
    %108 = vector.shape_cast %107 : vector<8xf32> to vector<8x1xf32>
    %cst_54 = arith.constant dense<0.000000e+00> : vector<8x8xf32>
    %109 = tpu.matmul %106, %96, %cst_54 {dimension_numbers = #tpu.dot_dimension_numbers<[1], [0], [0], [1], [0, 0, 1, 1], [], []>} : vector<8x8xf32>, vector<8x8xf32>, vector<8x8xf32> -> vector<8x8xf32>
    %110 = tpu.reciprocal %108 {approx = true} : vector<8x1xf32> -> vector<8x1xf32>
    %111 = vector.broadcast %110 : vector<8x1xf32> to vector<8x8xf32>
    %112 = arith.mulf %109, %111 : vector<8x8xf32>
    %c24 = arith.constant 24 : index
    %c0_55 = arith.constant 0 : index
    %113 = vector.load %arg11[%c24, %c0_55] : memref<32x32xf32, #tpu.memory_space<vmem>>, vector<8x32xf32>
    %cst_56 = arith.constant dense<0.000000e+00> : vector<8x32xf32>
    %114 = tpu.matmul %112, %113, %cst_56 {dimension_numbers = #tpu.dot_dimension_numbers<[1], [0], [0], [1], [0, 0, 1, 1], [], []>} : vector<8x8xf32>, vector<8x32xf32>, vector<8x32xf32> -> vector<8x32xf32>
    %115 = arith.addf %93, %114 : vector<8x32xf32>
    %c0_57 = arith.constant 0 : index
    %c0_58 = arith.constant 0 : index
    %116 = vector.load %arg12[%c0_57, %c0_58] : memref<1x32xf32, #tpu.memory_space<vmem>>, vector<1x32xf32>
    %117 = vector.broadcast %116 : vector<1x32xf32> to vector<8x32xf32>
    %118 = arith.addf %115, %117 : vector<8x32xf32>
    %c0_59 = arith.constant 0 : index
    %c0_60 = arith.constant 0 : index
    %c0_61 = arith.constant 0 : index
    %119 = vector.load %arg13[%c0_59, %c0_60, %c0_61] : memref<1x8x32xf32, #tpu.memory_space<vmem>>, vector<1x8x32xf32>
    %120 = vector.shape_cast %119 : vector<1x8x32xf32> to vector<8x32xf32>
    %121 = vector.shape_cast %118 : vector<8x32xf32> to vector<1x8x32xf32>
    tpu.vector_store %arg13[%c0_59, %c0_60, %c0_61], %121 {strides = array<i32>} : memref<1x8x32xf32, #tpu.memory_space<vmem>>, vector<1x8x32xf32>,
    return
  }
  func.func @transform_0(%arg0: i32) -> (i32, i32, i32) {
    %c0_i32 = arith.constant 0 : i32
    %c0_i32_0 = arith.constant 0 : i32
    %c0_i32_1 = arith.constant 0 : i32
    return %arg0, %c0_i32, %c0_i32_0 : i32, i32, i32
  }
  func.func @transform_1(%arg0: i32) -> (i32, i32, i32) {
    %c0_i32 = arith.constant 0 : i32
    %c0_i32_0 = arith.constant 0 : i32
    %c0_i32_1 = arith.constant 0 : i32
    return %arg0, %c0_i32, %c0_i32_0 : i32, i32, i32
  }
  func.func @transform_2(%arg0: i32) -> (i32, i32, i32) {
    %c0_i32 = arith.constant 0 : i32
    %c0_i32_0 = arith.constant 0 : i32
    %c0_i32_1 = arith.constant 0 : i32
    return %arg0, %c0_i32, %c0_i32_0 : i32, i32, i32
  }
  func.func @transform_3(%arg0: i32) -> (i32, i32, i32) {
    %c0_i32 = arith.constant 0 : i32
    %c0_i32_0 = arith.constant 0 : i32
    %c0_i32_1 = arith.constant 0 : i32
    return %arg0, %c0_i32, %c0_i32_0 : i32, i32, i32
  }
  func.func @transform_4(%arg0: i32) -> (i32, i32) {
    %c0_i32 = arith.constant 0 : i32
    %c0_i32_0 = arith.constant 0 : i32
    %c0_i32_1 = arith.constant 0 : i32
    return %c0_i32, %c0_i32_0 : i32, i32
  }
  func.func @transform_5(%arg0: i32) -> (i32, i32) {
    %c0_i32 = arith.constant 0 : i32
    %c0_i32_0 = arith.constant 0 : i32
    %c0_i32_1 = arith.constant 0 : i32
    return %c0_i32, %c0_i32_0 : i32, i32
  }
  func.func @transform_6(%arg0: i32) -> (i32, i32) {
    %c0_i32 = arith.constant 0 : i32
    %c0_i32_0 = arith.constant 0 : i32
    %c0_i32_1 = arith.constant 0 : i32
    return %c0_i32, %c0_i32_0 : i32, i32
  }
  func.func @transform_7(%arg0: i32) -> (i32, i32) {
    %c0_i32 = arith.constant 0 : i32
    %c0_i32_0 = arith.constant 0 : i32
    %c0_i32_1 = arith.constant 0 : i32
    return %c0_i32, %c0_i32_0 : i32, i32
  }
  func.func @transform_8(%arg0: i32) -> (i32, i32) {
    %c0_i32 = arith.constant 0 : i32
    %c0_i32_0 = arith.constant 0 : i32
    %c0_i32_1 = arith.constant 0 : i32
    return %c0_i32, %c0_i32_0 : i32, i32
  }
  func.func @transform_9(%arg0: i32) -> (i32, i32) {
    %c0_i32 = arith.constant 0 : i32
    %c0_i32_0 = arith.constant 0 : i32
    %c0_i32_1 = arith.constant 0 : i32
    return %c0_i32, %c0_i32_0 : i32, i32
  }
  func.func @transform_10(%arg0: i32) -> (i32, i32) {
    %c0_i32 = arith.constant 0 : i32
    %c0_i32_0 = arith.constant 0 : i32
    %c0_i32_1 = arith.constant 0 : i32
    return %c0_i32, %c0_i32_0 : i32, i32
  }
  func.func @transform_11(%arg0: i32) -> (i32, i32) {
    %c0_i32 = arith.constant 0 : i32
    %c0_i32_0 = arith.constant 0 : i32
    %c0_i32_1 = arith.constant 0 : i32
    return %c0_i32, %c0_i32_0 : i32, i32
  }
  func.func @transform_12(%arg0: i32) -> (i32, i32, i32) {
    %c0_i32 = arith.constant 0 : i32
    %c0_i32_0 = arith.constant 0 : i32
    %c0_i32_1 = arith.constant 0 : i32
    return %arg0, %c0_i32, %c0_i32_0 : i32, i32, i32
  }
}

</mosaic_0001>

<bundles_post_ra>
// kernel: tpu_custom_call.1
= control target key start
LH: loop header
LB: loop body
LE: loop exit
PB: predicated region body
PF: predicated region fallthrough
CT: control target
= control target key end

     0   :  { %s3062_s0 = inlined_call_operand.hbm [shape: f32[2,8,32], index: 0, kind: input, shape index: {}]   ;;  %s3063_s1 = inlined_call_operand.hbm [shape: f32[2,8,24], index: 1, kind: input, shape index: {}]   ;;  %s3064_s2 = inlined_call_operand.hbm [shape: f32[2,8,24], index: 2, kind: input, shape index: {}]   ;;  %s3065_s3 = inlined_call_operand.vmem [shape: f32[2,1,8], index: 3, kind: input, shape index: {}]   ;;  %s3066_s4 = inlined_call_operand.hbm [shape: f32[32,32], index: 4, kind: input, shape index: {}]   ;;  %s3067_s5 = inlined_call_operand.vmem [shape: f32[1,32], index: 5, kind: input, shape index: {}]   ;;  %s3068_s6 = inlined_call_operand.hbm [shape: f32[24,32], index: 6, kind: input, shape index: {}]   ;;  %s3069_s7 = inlined_call_operand.vmem [shape: f32[1,32], index: 7, kind: input, shape index: {}]   ;;  %s3070_s8 = inlined_call_operand.hbm [shape: f32[24,32], index: 8, kind: input, shape index: {}]   ;;  %s3071_s9 = inlined_call_operand.vmem [shape: f32[1,32], index: 9, kind: input, shape index: {}]   ;;  %s3072_s10 = inlined_call_operand.vmem [shape: f32[32,32], index: 10, kind: input, shape index: {}]   ;;  %s3073_s11 = inlined_call_operand.vmem [shape: f32[1,32], index: 11, kind: input, shape index: {}]   ;;  %s3074_s12 = inlined_call_operand.hbm [shape: f32[2,8,32], index: 12, kind: output, shape index: {}]  }
   0x1   :  { %3101 = sst [smem:[#allocation25_spill]] %s3063_s1 }
   0x2   :  { %3102 = sst [smem:[#allocation26_spill]] %s3065_s3 }
   0x3   :  { %3103 = sst [smem:[#allocation27_spill]] %s3066_s4 }
   0x4   :  { %3104 = sst [smem:[#allocation28_spill]] %s3071_s9 }
   0x5   :  { %3105 = sst [smem:[#allocation29_spill]] %s3072_s10 }
   0x6   :  { %3106 = sst [smem:[#allocation30_spill]] %s3073_s11 }
   0x7   :  { %3107 = sst [smem:[#allocation31_spill]] %s3074_s12 }
   0x8   :  { %17 = vsyncpa [#allocation3], 0 }
   0x9   :  { %19 = vsyncpa [#allocation3 + $0x1], 0 }
   0xa   :  { %20 = vsyncpa [#allocation6], 0 }
   0xb   :  { %22 = vsyncpa [#allocation6 + $0x1], 0 }
   0xc   :  { %23 = vsyncpa [#allocation9], 0 }
   0xd   :  { %24 = vsyncpa [#allocation12], 0 }
   0xe   :  { %25 = vsyncpa [#allocation4], 0 }
   0xf   :  { %27 = vsyncpa [#allocation4 + $0x1], 0  ;;  %s2590_s21 = smov 0   ;;  %s2592_s22 = smov 0  }
  0x10   :  { %s2594_s23 = smov 0   ;;  %s2596_s24 = smov 0  }
  0x11 LB: > { %3108 = sst [smem:[#allocation19_spill]] %s2496_s21  ;;  %s2611_s25 = sadd.s32 4294967295, %s2508_s24   ;;  %s2508_s24 = sphi %s2596_s24, %s3151_s24   ;;  %s2504_s23 = sphi %s2594_s23, %s3155_s23   ;;  %s2500_s22 = sphi %s2592_s22, %s3154_s22   ;;  %s2496_s21 = sphi %s2590_s21, %s3153_s21  }
  0x12   : > { %3109 = sst [smem:[#allocation20_spill]] %s2508_s24  ;;  %s1959_s26 = sadd.s32 4294967294, %s2508_s24  }
  0x13   : > { %p53_p0 = scmp.ne.s32.totalorder %s2500_s22, %s2496_s21  ;;  %p3078_p1 = scmp.eq.s32.totalorder %s2611_s25, 0 }
  0x14   : > { %p329_p3 = scmp.eq.s32.totalorder %s1959_s26, 1  ;;  %p1960_p5 = scmp.ge.s32.totalorder %s2508_s24, 1 }
  0x15   : > { %p2620_p4 = por %p3078_p1, %p53_p0  ;;  %p336_p7 = scmp.lt.s32.totalorder %s2508_s24, 3 }
  0x16   : > { %p2625_p6 = por %p329_p3, %p53_p0  ;;  %s2510_s30 = smov [#allocation8]  }
  0x17   : > { %s3110_s27 = scalar_select %p2620_p4, 1, 0 }
  0x18   : > { %s3111_s28 = scalar_select %p2625_p6, 1, 0 }
  0x19   : > { %p2630_p8 = pnand %p1960_p5, %p336_p7  ;;  %s348_s13 = sshll.u32 %s2510_s30, 4  ;;  %s2634_s13 = int_to_ptr.vmem [resolvable:$true] %s348_s13 }
  0x1a   : > { %3112 = sst [smem:[#allocation21_spill]] %s3111_s28  ;;  %s2646_s15 = sadd.s32 1, %s2508_s24  }
  0x1b   : > { %s3113_s29 = scalar_select %p2630_p8, 1, 0 }
  0x1c   : > { %p2165_p9 = pneg %p2630_p8  ;;  %3115 = sst [smem:[#allocation22_spill]] %s2646_s15 }
  0x1d   : > { %s40_s16 = sadd.s32 1, %s2504_s23  ;;  %s37_s17 = ssub.s32 %s2508_s24, %s2646_s15 }
  0x1e   : > { %p2641_p11 = pnand %p2165_p9, %p3078_p1  ;;  %s3116_s4 = sld [smem:[#allocation27_spill]] }
  0x20   : > { %s3114_s14 = scalar_select %p2641_p11, 1, 0 }
  0x21   : > { %p2659_p13 = pneg %p2641_p11 }
  0x23   : > { %s3117_s28 = scalar_select %p2659_p13, 1, 0 }
  0x24   : > { %s2256_s20 = scalar_lea.hbm %s3116_s4, 512 }
  0x25   : > { %p2257_p12 = scmp.ne.s32.totalorder %s3116_s4, %s2256_s20  ;;  %p2263_p5 = scmp.lt.u32.totalorder %s2256_s20, %s3116_s4 }
  0x27   : > { %p2259_p0 = pnand %p2659_p13, %p2257_p12 }
  0x29   : > { %p2260_p3 = pneg %p2259_p0 }
  0x2b   : > { %p2265_p7 = pnand %p2263_p5, %p2260_p3 }
  0x2d   : > { %2268 = shalt.err (!%p2265_p7)
}
  0x2e   : > { %s2269_s18 = scalar_lea.vmem %s2634_s13, 512  ;;  %p2277_p2 = scmp.lt.s32.totalorder %s2634_s13, %s2634_s13 }
  0x2f   : > { %p2270_p9 = scmp.ne.s32.totalorder %s2634_s13, %s2269_s18  ;;  %p2278_p6 = scmp.lt.s32.totalorder %s2269_s18, %s2269_s18 }
  0x31   : > { %p2272_p10 = pnand %p2270_p9, %p2659_p13  ;;  %p2279_p12 = por %p2278_p6, %p2277_p2 }
  0x33   : > { %p2273_p1 = pneg %p2272_p10 }
  0x35   : > { %p2280_p0 = pnand %p2279_p12, %p2273_p1 }
  0x37   : > { %2283 = shalt.err (!%p2280_p0)
}
  0x38   : > { %s3081_s19 = smov 128   ;;  %s3083_s12 = smov 8  }
  0x39   : > { %2168 = dma.hbm_to_vmem [thread:$0]  (!%p2641_p11), %s3116_s4, 512, %s2634_s13, [#allocation9], %s3081_s19, %s3081_s19, %s3083_s12  }
  0x3a   : > { %p38_p1 = scmp.eq.s32.totalorder %s37_s17, 0  ;;  %p47_p2 = scmp.ne.s32.totalorder %s2504_s23, %s2500_s22 }
  0x3b   : > { %p48_p6 = scmp.eq.s32.totalorder %s2508_s24, 0  ;;  %p2192_p10 = scmp.lt.s32.totalorder %s2508_s24, 2 }
  0x3c   : > { %s2688_s26 = scalar_select %p38_p1, %s2504_s23, %s40_s16  }
  0x3d   : > { %p49_p3 = por %p48_p6, %p47_p2  ;;  %p3119_p5 = scmp.eq.s32.totalorder %s2611_s25, 1 }
  0x3e   : > { %3118 = sst [smem:[#allocation23_spill]] %s2688_s26  ;;  %s3085_s18 = sand.u32 1, %s2504_s23  }
  0x3f   : > { %p2692_p7 = por %p3119_p5, %p47_p2  ;;  %s2698_s15 = sshll.u32 %s2508_s24, 7 }
  0x40   : > { %s2702_s11 = sshll.u32 %s3085_s18, 3  ;;  %p2704_p9 = pnand %p2192_p10, %p49_p3 }
  0x41   : > { %s3120_s30 = scalar_select %p2692_p7, 1, 0 }
  0x42   : > { %s3122_s13 = scalar_select %p2704_p9, 1, 0 }
  0x43   : > { %3121 = sst [smem:[#allocation24_spill]] %s3120_s30  ;;  %s421_s16 = sand.u32 1, %s2508_s24  }
  0x44   : > { %s3123_s1 = sld [smem:[#allocation25_spill]]  ;;  %s425_s19 = scalar_lea.vmem [#allocation5], %s2702_s11 }
  0x45   : > { %s432_s12 = sshll.u32 %s425_s19, 4  ;;  %s2718_s18 = scalar_lea.sflag [#allocation6], %s421_s16  ;;  %s2716_s12 = int_to_ptr.vmem [resolvable:$true] %s432_s12 }
  0x46   : > { %p2724_p0 = pneg %p2704_p9 }
  0x48   : > { %s3124_s26 = scalar_select %p2724_p0, 1, 0 }
  0x4a   : > { %s2713_s20 = scalar_lea.hbm %s3123_s1, %s2698_s15  ;;  %s2289_s24 = scalar_lea.hbm %s3123_s1, 256 }
  0x4b   : > { %s2284_s4 = scalar_lea.hbm %s2713_s20, 128  ;;  %p2290_p6 = scmp.lt.u32.totalorder %s2713_s20, %s3123_s1 }
  0x4c   : > { %p2285_p12 = scmp.ne.s32.totalorder %s2713_s20, %s2284_s4  ;;  %p2291_p10 = scmp.lt.u32.totalorder %s2289_s24, %s2284_s4 }
  0x4d   : > { %p2293_p5 = scmp.lt.u32.totalorder %s2284_s4, %s2713_s20 }
  0x4e   : > { %p2287_p1 = pnand %p2724_p0, %p2285_p12  ;;  %p2292_p3 = por %p2291_p10, %p2290_p6 }
  0x50   : > { %p2288_p2 = pneg %p2287_p1  ;;  %p2294_p7 = por %p2293_p5, %p2292_p3 }
  0x52   : > { %p2295_p4 = pnand %p2294_p7, %p2288_p2 }
  0x54   : > { %2298 = shalt.err (!%p2295_p4)
}
  0x55   : > { %s2299_s16 = scalar_lea.vmem %s2716_s12, 128  ;;  %s2513_s17 = smov [#allocation5]  }
  0x56   : > { %p2300_p12 = scmp.ne.s32.totalorder %s2716_s12, %s2299_s16  ;;  %s2304_s21 = sshll.u32 %s2513_s17, 4  ;;  %s2305_s21 = int_to_ptr.vmem [resolvable:$false] %s2304_s21 }
  0x57   : > { %s2306_s30 = scalar_lea.vmem %s2305_s21, 256  ;;  %p2307_p11 = scmp.lt.s32.totalorder %s2716_s12, %s2305_s21 }
  0x58   : > { %p2302_p1 = pnand %p2300_p12, %p2724_p0  ;;  %p2308_p13 = scmp.lt.s32.totalorder %s2306_s30, %s2299_s16 }
  0x5a   : > { %p2303_p8 = pneg %p2302_p1  ;;  %p2309_p6 = por %p2308_p13, %p2307_p11 }
  0x5c   : > { %p2310_p10 = pnand %p2309_p6, %p2303_p8 }
  0x5e   : > { %2313 = shalt.err (!%p2310_p10)
}
  0x5f   : > { %2181 = dma.hbm_to_vmem [thread:$0]  (!%p2704_p9), %s2713_s20, 128, %s2716_s12, %s2718_s18  }
  0x60   : > { %s2514_s4 = smov [#allocation10]   ;;  %s2515_s19 = smov [#allocation11]  }
  0x61   : > { %s364_s24 = sshll.u32 %s2514_s4, 4  ;;  %s380_s1 = sshll.u32 %s2515_s19, 4  ;;  %s365_s24 = int_to_ptr.vmem [resolvable:$true] %s364_s24  ;;  %s381_s1 = int_to_ptr.vmem [resolvable:$true] %s380_s1 }
  0x62   : > { %s2314_s21 = scalar_lea.hbm %s3068_s6, 384  ;;  %p3125_p8 = scmp.ne.s32.totalorder %s3117_s28, 0 }
  0x63   : > { %p2315_p4 = scmp.ne.s32.totalorder %s3068_s6, %s2314_s21  ;;  %p2321_p7 = scmp.lt.u32.totalorder %s2314_s21, %s3068_s6 }
  0x65   : > { %p2317_p11 = pnand %p2315_p4, %p3125_p8 }
  0x67   : > { %p2318_p13 = pneg %p2317_p11 }
  0x69   : > { %p2323_p2 = pnand %p2321_p7, %p2318_p13 }
  0x6b   : > { %2326 = shalt.err (!%p2323_p2)
}
  0x6c   : > { %s2327_s12 = scalar_lea.vmem %s365_s24, 384  ;;  %p2335_p1 = scmp.lt.s32.totalorder %s365_s24, %s365_s24 }
  0x6d   : > { %p2328_p3 = scmp.ne.s32.totalorder %s365_s24, %s2327_s12  ;;  %p2336_p6 = scmp.lt.s32.totalorder %s2327_s12, %s2327_s12 }
  0x6f   : > { %p2330_p5 = pnand %p2328_p3, %p3125_p8  ;;  %p2337_p10 = por %p2336_p6, %p2335_p1 }
  0x71   : > { %p2331_p12 = pneg %p2330_p5 }
  0x73   : > { %p2338_p9 = pnand %p2337_p10, %p2331_p12 }
  0x75   : > { %2341 = shalt.err (!%p2338_p9)
}
  0x76   : > { %p3126_p4 = scmp.ne.s32.totalorder %s3114_s14, 0  ;;  %s3127_s10 = smov 8  }
  0x77   : > { %s3128_s20 = smov 128   ;;  %s2342_s17 = scalar_lea.hbm %s3070_s8, 384 }
  0x78   : > { %2171 = dma.hbm_to_vmem [thread:$0]  (!%p3126_p4), %s3068_s6, 384, %s365_s24, [#allocation9], %s3128_s20, %s3128_s20, %s3127_s10  }
  0x79   : > { %p2343_p11 = scmp.ne.s32.totalorder %s3070_s8, %s2342_s17  ;;  %p2349_p7 = scmp.lt.u32.totalorder %s2342_s17, %s3070_s8 }
  0x7b   : > { %p2345_p9 = pnand %p2343_p11, %p3125_p8 }
  0x7d   : > { %p2346_p13 = pneg %p2345_p9 }
  0x7f   : > { %p2351_p2 = pnand %p2349_p7, %p2346_p13 }
  0x81   : > { %2354 = shalt.err (!%p2351_p2)
}
  0x82   : > { %s2355_s3 = scalar_lea.vmem %s381_s1, 384  ;;  %p2363_p1 = scmp.lt.s32.totalorder %s381_s1, %s381_s1 }
  0x83   : > { %p2356_p3 = scmp.ne.s32.totalorder %s381_s1, %s2355_s3  ;;  %p2364_p6 = scmp.lt.s32.totalorder %s2355_s3, %s2355_s3 }
  0x85   : > { %p2358_p5 = pnand %p2356_p3, %p3125_p8  ;;  %p2365_p10 = por %p2364_p6, %p2363_p1 }
  0x87   : > { %p2359_p12 = pneg %p2358_p5 }
  0x89   : > { %p2366_p0 = pnand %p2365_p10, %p2359_p12 }
  0x8b   : > { %2369 = shalt.err (!%p2366_p0)
}
  0x8c   : > { %2174 = dma.hbm_to_vmem [thread:$0]  (!%p3126_p4), %s3070_s8, 384, %s381_s1, [#allocation12], %s3128_s20, %s3128_s20, %s3127_s10  }
  0x8d   : > { %s2794_s19 = scalar_lea.hbm %s3062_s0, %s2698_s15  ;;  %s407_s14 = scalar_lea.vmem [#allocation2], %s2702_s11 }
  0x8e   : > { %s414_s17 = sshll.u32 %s407_s14, 4  ;;  %s2803_s30 = scalar_lea.hbm %s3064_s2, %s2698_s15  ;;  %s2797_s17 = int_to_ptr.vmem [resolvable:$true] %s414_s17 }
  0x8f   : > { %s3129_s12 = sand.u32 1, %s2504_s23   ;;  %s2370_s10 = scalar_lea.hbm %s2794_s19, 128 }
  0x90   : > { %s404_s1 = scalar_lea.sflag [#allocation3], %s3129_s12  ;;  %p2371_p0 = scmp.ne.s32.totalorder %s2794_s19, %s2370_s10 }
  0x91   : > { %p3130_p8 = scmp.ne.s32.totalorder %s3124_s26, 0  ;;  %s2375_s24 = scalar_lea.hbm %s3062_s0, 256 }
  0x92   : > { %p2376_p9 = scmp.lt.u32.totalorder %s2794_s19, %s3062_s0  ;;  %p2377_p13 = scmp.lt.u32.totalorder %s2375_s24, %s2370_s10 }
  0x93   : > { %p2373_p4 = pnand %p2371_p0, %p3130_p8  ;;  %p2379_p2 = scmp.lt.u32.totalorder %s2370_s10, %s2794_s19 }
  0x94   : > { %p2378_p7 = por %p2377_p13, %p2376_p9 }
  0x95   : > { %p2374_p11 = pneg %p2373_p4 }
  0x96   : > { %p2380_p3 = por %p2379_p2, %p2378_p7 }
  0x98   : > { %p2381_p5 = pnand %p2380_p3, %p2374_p11 }
  0x9a   : > { %2384 = shalt.err (!%p2381_p5)
}
  0x9b   : > { %s2385_s15 = scalar_lea.vmem %s2797_s17, 128  ;;  %s2516_s4 = smov [#allocation2]  }
  0x9c   : > { %p2386_p12 = scmp.ne.s32.totalorder %s2797_s17, %s2385_s15  ;;  %s2390_s14 = sshll.u32 %s2516_s4, 4  ;;  %s2391_s14 = int_to_ptr.vmem [resolvable:$false] %s2390_s14 }
  0x9d   : > { %s2392_s21 = scalar_lea.vmem %s2391_s14, 256  ;;  %p2393_p10 = scmp.lt.s32.totalorder %s2797_s17, %s2391_s14 }
  0x9e   : > { %p2388_p1 = pnand %p2386_p12, %p3130_p8  ;;  %p2394_p0 = scmp.lt.s32.totalorder %s2392_s21, %s2385_s15 }
  0xa0   : > { %p2389_p6 = pneg %p2388_p1  ;;  %p2395_p4 = por %p2394_p0, %p2393_p10 }
  0xa2   : > { %p2396_p9 = pnand %p2395_p4, %p2389_p6 }
  0xa4   : > { %2399 = shalt.err (!%p2396_p9)
}
  0xa5   : > { %p3131_p11 = scmp.ne.s32.totalorder %s3122_s13, 0  ;;  %s443_s16 = scalar_lea.vmem [#allocation7], %s2702_s11 }
  0xa6   : > { %s450_s12 = sshll.u32 %s443_s16, 4  ;;  %s2400_s10 = scalar_lea.hbm %s2803_s30, 128  ;;  %s451_s12 = int_to_ptr.vmem [resolvable:$true] %s450_s12 }
  0xa7   : > { %2178 = dma.hbm_to_vmem [thread:$0]  (!%p3131_p11), %s2794_s19, 128, %s2797_s17, %s404_s1  }
  0xa8   : > { %p2401_p13 = scmp.ne.s32.totalorder %s2803_s30, %s2400_s10  ;;  %s2405_s24 = scalar_lea.hbm %s3064_s2, 256 }
  0xa9   : > { %p2406_p3 = scmp.lt.u32.totalorder %s2803_s30, %s3064_s2  ;;  %p2407_p5 = scmp.lt.u32.totalorder %s2405_s24, %s2400_s10 }
  0xaa   : > { %p2403_p7 = pnand %p2401_p13, %p3130_p8  ;;  %p2409_p1 = scmp.lt.u32.totalorder %s2400_s10, %s2803_s30 }
  0xab   : > { %p2408_p12 = por %p2407_p5, %p2406_p3 }
  0xac   : > { %p2404_p2 = pneg %p2403_p7 }
  0xad   : > { %p2410_p6 = por %p2409_p1, %p2408_p12 }
  0xaf   : > { %p2411_p10 = pnand %p2410_p6, %p2404_p2 }
  0xb1   : > { %2414 = shalt.err (!%p2411_p10)
}
  0xb2   : > { %s2415_s11 = scalar_lea.vmem %s451_s12, 128  ;;  %s2517_s19 = smov [#allocation7]  }
  0xb3   : > { %p2416_p0 = scmp.ne.s32.totalorder %s451_s12, %s2415_s11  ;;  %s2420_s17 = sshll.u32 %s2517_s19, 4  ;;  %s2421_s17 = int_to_ptr.vmem [resolvable:$false] %s2420_s17 }
  0xb4   : > { %s2422_s1 = scalar_lea.vmem %s2421_s17, 256  ;;  %p2423_p13 = scmp.lt.s32.totalorder %s451_s12, %s2421_s17 }
  0xb5   : > { %p2418_p4 = pnand %p2416_p0, %p3130_p8  ;;  %p2424_p7 = scmp.lt.s32.totalorder %s2422_s1, %s2415_s11 }
  0xb7   : > { %p2419_p9 = pneg %p2418_p4  ;;  %p2425_p11 = por %p2424_p7, %p2423_p13 }
  0xb9   : > { %p2426_p3 = pnand %p2425_p11, %p2419_p9 }
  0xbb   : > { %2429 = shalt.err (!%p2426_p3)
}
  0xbc   : > { %p3132_p5 = scmp.ne.s32.totalorder %s3122_s13, 0  ;;  %p3133_p2 = scmp.ne.s32.totalorder %s3113_s29, 0 }
  0xbd   : > { %s2850_s26 = sand.u32 (!%p3133_p2), 1, %s2500_s22   ;;  %p3134_p8 = scmp.ne.s32.totalorder (!%p3133_p2), %s3110_s27, 0 }
  0xbe   : > { %2184 = dma.hbm_to_vmem [thread:$0]  (!%p3132_p5), %s2803_s30, 128, %s451_s12, %s2718_s18  }
  0xbf   : > { %465 = sbr.rel (%p3133_p2) target bundleno = 2337 (0x921), region = 68  ;;  %s2853_s15 = sshll.u32 (!%p3133_p2), %s2850_s26, 3 }
  0xc0   : > { %s468_s4 = scalar_lea.sflag (!%p3133_p2), [#allocation3], %s2850_s26  ;;  %s471_s14 = scalar_lea.vmem (!%p3133_p2), [#allocation2], %s2853_s15 }
  0xc6   : > { %2475 = dma.done.wait (%p3134_p8), %s468_s4, 128  }
  0xc7   : > { %2477 = vsyncadd (%p3134_p8), %s468_s4, 4294967168  ;;  %s476_s29 = sand.u32 1, %s2611_s25   ;;  %s480_s13 = scalar_lea.vmem [#allocation5], %s2853_s15 }
  0xc8   : > { %s477_s18 = scalar_lea.sflag [#allocation6], %s476_s29 }
  0xc9   : > { %2479 = dma.done.wait (%p3134_p8), %s477_s18, 256  }
  0xca   : > { %2481 = vsyncadd (%p3134_p8), %s477_s18, 4294967040  ;;  %s489_s30 = scalar_lea.vmem [#allocation7], %s2853_s15  ;;  %p3135_p11 = scmp.eq.s32.totalorder %s2611_s25, 0 }
  0xcc   : > { %2483 = dma.done.wait (%p3135_p11), [#allocation9], 896   ;;  %p3136_p12 = pmov %p3135_p11 }
  0xcd   : > { %p3137_p1 = pmov %p3135_p11 }
  0xce   : > { %2485 = vsyncadd (%p3136_p12), [#allocation9], 4294966400 }
  0xcf   : > { %2487 = dma.done.wait (%p3137_p1), [#allocation12], 384   ;;  %p3138_p6 = pmov %p3137_p1 }
  0xd0   : > { %v2518_v0 = vmov 0.0|0.0   ;;  %vm2519_vm0 = vmmov 0   ;;  %v2520_v1 = vmov 0.0   ;;  %v647_v2 = vld [vmem:[#allocation10] sm:$0xff]  ;;  %v648_v3 = vld [vmem:[#allocation10 + $0x8] sm:$0xff]  ;;  %v564_v7 = vld [vmem:[#allocation8 + $0x10] sm:$0xff]  ;;  %v895_v33 = vlaneseq }
  0xd1   : > { %2489 = vsyncadd (%p3138_p6), [#allocation12], 4294966912  ;;  %2139 = vmatprep.subr.bf16.mxu1 %v2518_v0  ;;  %2133 = vmatprep.subr.bf16.mxu0 %v2518_v0  ;;  %v562_v4 = vld [vmem:[#allocation8] sm:$0xff]  ;;  %v2140_v5 = vpack.c.bf16 %v648_v3, %v647_v2  ;;  %v563_v6 = vld [vmem:[#allocation8 + $0x8] sm:$0xff]  ;;  %vm657_vm1 = vcmask 195584   ;;  %vm573_vm2 = vcmask 261120  }
  0xd2   : > { %2061 = vmatprep.mubr.msk.f32.mxu1 %vm2519_vm0, %v2520_v1  ;;  %2052 = vmatprep.mubr.msk.f32.mxu0 %vm2519_vm0, %v2520_v1  ;;  %v2134_v8 = vpack.c.bf16 %v563_v6, %v562_v4  ;;  %v565_v9 = vld [vmem:[#allocation8 + $0x18] sm:$0xff]  ;;  %v732_v11 = vld [vmem:[#allocation11 + $0x8] sm:$0xff]  ;;  %v649_v12 = vld [vmem:[#allocation10 + $0x10] sm:$0xff]  ;;  %vm816_vm3 = vcmask 64512   ;;  %s2521_s10 = smov 120   ;;  %s3139_s24 = sld [smem:[#allocation28_spill]] }
  0xd3   : > { %2141 = vmatpush3.bf16.msra.mxu1 %v2140_v5  ;;  %v731_v10 = vld [vmem:[#allocation11] sm:$0xff]  ;;  %v2137_v13 = vpack.c.bf16 %v565_v9, %v564_v7  ;;  %v559_v14 = vld [vmem:[%s480_s13] sm:$0xff]  ;;  %v1981_v19 = vld [vmem:[%s3069_s7] ss:$0 sm:$0xff]  ;;  %s2522_s9 = smov 112   ;;  %p555_p10 = scmp.lt.s32.totalorder %s2611_s25, 1 }
  0xd4   : > { %2135 = vmatpush3.bf16.msra.mxu0 %v2134_v8  ;;  %2059 = vmatprep.subr.mxu1 %v2520_v1  ;;  %v2143_v15 = vpack.c.bf16 %v732_v11, %v731_v10  ;;  %v558_v16 = vld [vmem:[%s471_s14] sm:$0xff]  ;;  %v733_v17 = vld [vmem:[#allocation11 + $0x10] sm:$0xff]  ;;  %s3140_s17 = sld [smem:[#allocation26_spill]]  ;;  %v896_v36 = vshrl.u32 %v895_v33, 7  ;;  %s2523_s4 = smov 104  }
  0xd5   : > { %2136 = vmatprep.subr.bf16.mxu0 %v2518_v0  ;;  %v560_v18 = vld [vmem:[%s489_s30] sm:$0xff]  ;;  %s556_s28 = scalar_select %p555_p10, %s2611_s25, 1 }
  0xd6   : > { %v1979_v23 = vld [vmem:[%s3067_s5] ss:$0 sm:$0xff]  ;;  %v897_v38 = vsub.s32 0, %v896_v36  ;;  %s3141_s18 = sld [smem:[#allocation29_spill]]  ;;  %s1795_s14 = scalar_lea.sflag [#allocation4], %s2850_s26 }
  0xd7   : > { %2060 = vmatpush3.msra.mxu1 %v649_v12 }
  0xd8   : > { %2138 = vmatpush3.bf16.msra.mxu0 %v2137_v13  ;;  %2062 = vmatmul.mubr.msk.f32.vlgmr.msra.gmra.mrb[0].mxu1 %vm657_vm1, %v559_v14  ;;  %v1983_v27 = vld [vmem:[%s3139_s24] ss:$0 sm:$0xff]  ;;  %s3143_s24 = sld [smem:[#allocation30_spill]] }
  0xd9   : > { %2142 = vmatprep.subr.bf16.mxu1 %v2518_v0  ;;  %2070 = vmatprep.mubr.msk.f32.mxu1 %vm2519_vm0, %v2520_v1 }
  0xda   : > { %2144 = vmatpush3.bf16.msra.mxu1 %v2143_v15  ;;  %2073 = vmatprep.subr.mxu0 %v2520_v1  ;;  %s557_s1 = scalar_lea.vmem %s3140_s17, %s556_s28  ;;  %s554_s28 = scalar_lea.vmem [#allocation13], %s2853_s15 }
  0xdb   : > { %2053 = vmatmul.mubr.msk.f32.vlgmr.msra.gmra.mrb[0].mxu0 %vm573_vm2, %v558_v16  ;;  %2068 = vmatprep.subr.mxu1 %v2520_v1  ;;  %v561_v34 = vld [vmem:[%s557_s1] sm:$0x1]  ;;  %s1808_s11 = sshll.u32 %s554_s28, 4  ;;  %s3144_s1 = sld [smem:[#allocation31_spill]]  ;;  %s3019_s11 = int_to_ptr.vmem [resolvable:$true] %s1808_s11 }
  0xdc   : > { %2075 = vmatprep.mubr.msk.f32.mxu0 %vm2519_vm0, %v2520_v1  ;;  %v1985_v35 = vadd.f32 -1.0, %v561_v34  ;;  %v985_v59 = vld [vmem:[%s3141_s18] sm:$0xff]  ;;  %v1154_v62 = vld [vmem:[%s3141_s18 + $0x8] sm:$0xff]  ;;  %s2430_s29 = scalar_lea.vmem %s3019_s11, 128 }
  0xdd   : > { %p2431_p0 = scmp.ne.s32.totalorder %s3019_s11, %s2430_s29 }
  0xde   : > { %2069 = vmatpush3.msra.mxu1 %v733_v17  ;;  %v815_v37 = vmul.f32 1e+30, %v1985_v35 }
  0xdf   : > { %2071 = vmatmul.mubr.msk.f32.vlgmr.msra.gmra.mrb[2].mxu1 %vm657_vm1, %v560_v18  ;;  %2083 = vmatprep.subr.mxu1 %v2520_v1 }
  0xe0   : > { %2085 = vmatprep.mubr.msk.f32.mxu1 %vm2519_vm0, %v2520_v1  ;;  %v2938_v39 = vrot.slane %v815_v37, %v897_v38 }
 0x1ab   : > { %v727_v20 = vpop.f32.mrb[0].mxu1 }
 0x1ac   : > { %v2902_v21 = vadd.f32 %v1981_v19, %v727_v20  ;;  %v2063_v22 = vpop.f32.mrb[1].mxu1 }
 0x1ae   : > { %988 = vrot.lane.b32.xlu0 %v2902_v21, %s2521_s10  ;;  %v643_v24 = vpop.f32.mrb[0].mxu0  ;;  %2074 = vmatpush3.xpose.msk.msra.mxu0 %vm816_vm3, %v2902_v21 }
 0x1af   : > { %v2910_v25 = vadd.f32 %v1979_v23, %v643_v24  ;;  %v2054_v26 = vpop.f32.mrb[1].mxu0  ;;  %2078 = vmatprep.subr.mxu0 %v2520_v1 }
 0x1b1   : > { %2076 = vmatmul.mubr.msk.f32.vlgmr.msra.gmra.mrb[2].mxu0 %vm816_vm3, %v2910_v25 }
 0x1b2   : > { %986 = vrot.lane.b32.xlu0 %v2910_v25, %s2521_s10  ;;  %v810_v28 = vpop.f32.mrb[2].mxu1  ;;  %2080 = vmatprep.mubr.msk.f32.mxu0 %vm2519_vm0, %v2520_v1 }
 0x1b3   : > { %v2921_v29 = vadd.f32 %v1983_v27, %v810_v28  ;;  %v2072_v30 = vpop.f32.mrb[3].mxu1 }
 0x1b5   : > { %2079 = vmatpush3.msra.mxu0 %v2921_v29 }
 0x1b6   : > { %1076 = vrot.lane.b32.xlu0 %v2921_v29, %s2521_s10  ;;  %2088 = vmatprep.subr.mxu0 %v2520_v1  ;;  %s3142_s10 = sld [smem:[#allocation24_spill]] }
 0x1ba   : > { %1303 = vrot.lane.b32.xlu0 %v2902_v21, %s2522_s9 }
 0x1bc   : > { %p3145_p4 = scmp.ne.s32.totalorder %s3142_s10, 0 }
 0x1be   : > { %p2432_p9 = pnand %p2431_p0, %p3145_p4 }
 0x1c0   : > { %p2433_p13 = pneg %p2432_p9 }
 0x220   : > { %v989_v31 = vpop.permute.xlu0 %988 }
 0x221   : > { %2084 = vmatpush3.xpose.msk.msra.mxu1 %vm816_vm3, %v989_v31 }
 0x222   : > { %2093 = vmatprep.subr.mxu1 %v2520_v1 }
 0x224   : > { %v987_v32 = vpop.permute.xlu0 %986 }
 0x225   : > { %2086 = vmatmul.mubr.msk.f32.vlgmr.msra.gmra.mrb[4].mxu1 %vm816_vm3, %v987_v32 }
 0x226   : > { %2095 = vmatprep.mubr.msk.f32.mxu1 %vm2519_vm0, %v2520_v1  ;;  %2094 = vmatpush3.msra.mxu1 %v1154_v62 }
 0x227   : > { %2103 = vmatprep.subr.mxu1 %v2520_v1 }
 0x228   : > { %v1077_v54 = vpop.permute.xlu0 %1076 }
 0x22c   : > { %v1304_v63 = vpop.permute.xlu0 %1303 }
 0x284   : > { %v889_v40 = vpop.f32.mrb[2].mxu0 }
 0x285   : > { %v893_v41 = vmul.f32 0.35355338, %v889_v40  ;;  %v2077_v42 = vpop.f32.mrb[3].mxu0 }
 0x287   : > { %v900_v43 = vadd.f32 %v2938_v39, %v893_v41 }
 0x289   : > { %v901_v44 = vsel %vm816_vm3, %v900_v43, -inf }
 0x28a   : > { %902 = vmax.xlane.f32.xlu1 %v901_v44 }
 0x2f8   : > { %v1060_v45 = vpop.f32.mrb[4].mxu1 }
 0x2f9   : > { %v1064_v46 = vmul.f32 0.35355338, %v1060_v45  ;;  %v2087_v47 = vpop.f32.mrb[5].mxu1 }
 0x2fb   : > { %v1065_v48 = vadd.f32 %v1064_v46, %v2938_v39 }
 0x2fd   : > { %v1066_v49 = vsel %vm816_vm3, %v1065_v48, -inf }
 0x2fe   : > { %1067 = vmax.xlane.f32.xlu1 %v1066_v49 }
 0x317   : > { %v903_v50 = vpop.xlane.xlu1 %902 }
 0x318   : > { %v904_v51 = vsub.f32 %v900_v43, %v903_v50 }
 0x31a   : > { %v905_v52 = vmul.f32 1.442695, %v904_v51 }
 0x31c   : > { %2240 = vpow2.f32 %v905_v52 }
 0x326   : > { %v2241_v53 = vpop.eup %2240 }
 0x327   : > { %2081 = vmatmul.mubr.msk.f32.vlgmr.msra.gmra.mrb[4].mxu0 %vm816_vm3, %v2241_v53  ;;  %v907_v55 = vsel %vm816_vm3, %v2241_v53, 0.0 }
 0x328   : > { %908 = vadd.xlane.f32.xlu0 %v907_v55  ;;  %2089 = vmatpush3.msra.mxu0 %v1077_v54 }
 0x329   : > { %2090 = vmatprep.mubr.msk.f32.mxu0 %vm2519_vm0, %v2520_v1  ;;  %2098 = vmatprep.subr.mxu0 %v2520_v1 }
 0x33e   : > { %1390 = vrot.lane.b32.xlu0 %v2921_v29, %s2522_s9 }
 0x342   : > { %1543 = vrot.lane.b32.xlu0 %v2910_v25, %s2523_s4 }
 0x38b   : > { %v1068_v56 = vpop.xlane.xlu1 %1067 }
 0x38c   : > { %v1069_v57 = vsub.f32 %v1065_v48, %v1068_v56  ;;  %v2002_v56 = vld [vmem:[%s3143_s24] ss:$0 sm:$0xff] }
 0x38e   : > { %v1070_v58 = vmul.f32 1.442695, %v1069_v57 }
 0x390   : > { %2242 = vpow2.f32 %v1070_v58 }
 0x39a   : > { %v2243_v60 = vpop.eup %2242 }
 0x39b   : > { %2091 = vmatmul.mubr.msk.f32.vlgmr.msra.gmra.mrb[6].mxu0 %vm816_vm3, %v2243_v60  ;;  %v1072_v61 = vsel %vm816_vm3, %v2243_v60, 0.0 }
 0x39c   : > { %1073 = vadd.xlane.f32.xlu1 %v1072_v61  ;;  %2099 = vmatpush3.msra.mxu0 %v985_v59 }
 0x39d   : > { %2100 = vmatprep.mubr.msk.f32.mxu0 %vm2519_vm0, %v2520_v1  ;;  %2108 = vmatprep.subr.mxu0 %v2520_v1 }
 0x3ad   : > { %1301 = vrot.lane.b32.xlu1 %v2910_v25, %s2522_s9  ;;  %s2004_s9 = sshll.u32 %s2611_s25, 7  ;;  %s2524_s25 = smov [#allocation13]  }
 0x3ae   : > { %s2434_s15 = sshll.u32 %s2524_s25, 4  ;;  %s2435_s15 = int_to_ptr.vmem [resolvable:$false] %s2434_s15 }
 0x3af   : > { %s2436_s13 = scalar_lea.vmem %s2435_s15, 256  ;;  %p2437_p7 = scmp.lt.s32.totalorder %s3019_s11, %s2435_s15 }
 0x3b0   : > { %p2438_p3 = scmp.lt.s32.totalorder %s2436_s13, %s2430_s29 }
 0x3b2   : > { %p2439_p5 = por %p2438_p3, %p2437_p7 }
 0x3b4   : > { %p2440_p2 = pnand %p2439_p5, %p2433_p13 }
 0x3b5   : > { %v909_v0 = vpop.xlane.xlu0 %908 }
 0x3b6   : > { %2244 = vrcp.f32 %v909_v0 }
 0x3b9   : > { %v1391_v6 = vpop.permute.xlu0 %1390 }
 0x3bd   : > { %v1544_v31 = vpop.permute.xlu0 %1543 }
 0x3c0   : > { %v2245_v2 = vpop.eup %2244 }
 0x3fa   : > { %v979_v3 = vpop.f32.mrb[4].mxu0 }
 0x3fb   : > { %v984_v4 = vmul.f32 %v2245_v2, %v979_v3  ;;  %v2082_v5 = vpop.f32.mrb[5].mxu0 }
 0x3fd   : > { %2101 = vmatmul.mubr.msk.f32.vlgmr.msra.gmra.mrb[8].mxu0 %vm816_vm3, %v984_v4 }
 0x3fe   : > { %2109 = vmatpush3.msra.mxu0 %v1391_v6  ;;  %2110 = vmatprep.mubr.msk.f32.mxu0 %vm2519_vm0, %v2520_v1 }
 0x3ff   : > { %2118 = vmatprep.subr.mxu0 %v2520_v1 }
 0x429   : > { %v1074_v7 = vpop.xlane.xlu1 %1073 }
 0x42a   : > { %2246 = vrcp.f32 %v1074_v7 }
 0x42d   : > { %v1302_v12 = vpop.permute.xlu1 %1301 }
 0x434   : > { %v2247_v8 = vpop.eup %2246 }
 0x46e   : > { %v1148_v9 = vpop.f32.mrb[6].mxu0 }
 0x46f   : > { %v1153_v10 = vmul.f32 %v2247_v8, %v1148_v9  ;;  %v2092_v11 = vpop.f32.mrb[7].mxu0 }
 0x471   : > { %2096 = vmatmul.mubr.msk.f32.vlgmr.msra.gmra.mrb[6].mxu1 %vm816_vm3, %v1153_v10 }
 0x472   : > { %2104 = vmatpush3.xpose.msk.msra.mxu1 %vm816_vm3, %v1304_v63  ;;  %2105 = vmatprep.mubr.msk.f32.mxu1 %vm2519_vm0, %v2520_v1 }
 0x473   : > { %2113 = vmatprep.subr.mxu1 %v2520_v1 }
 0x475   : > { %2106 = vmatmul.mubr.msk.f32.vlgmr.msra.gmra.mrb[8].mxu1 %vm816_vm3, %v1302_v12 }
 0x476   : > { %2115 = vmatprep.mubr.msk.f32.mxu1 %vm2519_vm0, %v2520_v1 }
 0x4d0   : > { %v1297_v13 = vpop.f32.mrb[8].mxu0 }
 0x4d1   : > { %v2102_v14 = vpop.f32.mrb[9].mxu0 }
 0x544   : > { %v1224_v15 = vpop.f32.mrb[6].mxu1 }
 0x545   : > { %v1298_v16 = vadd.f32 %v1297_v13, %v1224_v15  ;;  %v2097_v17 = vpop.f32.mrb[7].mxu1 }
 0x548   : > { %v1375_v18 = vpop.f32.mrb[8].mxu1 }
 0x549   : > { %v1379_v19 = vmul.f32 0.35355338, %v1375_v18  ;;  %v2107_v20 = vpop.f32.mrb[9].mxu1 }
 0x54b   : > { %v1380_v22 = vadd.f32 %v1379_v19, %v2938_v39 }
 0x54d   : > { %v1381_v23 = vsel %vm816_vm3, %v1380_v22, -inf }
 0x54e   : > { %1382 = vmax.xlane.f32.xlu1 %v1381_v23 }
 0x55f   : > { %1545 = vrot.lane.b32.xlu1 %v2902_v21, %s2523_s4  ;;  %v1468_v21 = vld [vmem:[%s3141_s18 + $0x10] sm:$0xff] }
 0x560   : > { %2114 = vmatpush3.msra.mxu1 %v1468_v21 }
 0x561   : > { %2123 = vmatprep.subr.mxu1 %v2520_v1 }
 0x5db   : > { %v1383_v24 = vpop.xlane.xlu1 %1382 }
 0x5dc   : > { %v1384_v25 = vsub.f32 %v1380_v22, %v1383_v24 }
 0x5de   : > { %v1385_v26 = vmul.f32 1.442695, %v1384_v25 }
 0x5df   : > { %v1546_v28 = vpop.permute.xlu1 %1545 }
 0x5e0   : > { %2248 = vpow2.f32 %v1385_v26 }
 0x5ea   : > { %v2249_v27 = vpop.eup %2248 }
 0x5eb   : > { %2111 = vmatmul.mubr.msk.f32.vlgmr.msra.gmra.mrb[10].mxu0 %vm816_vm3, %v2249_v27  ;;  %v1387_v30 = vsel %vm816_vm3, %v2249_v27, 0.0 }
 0x5ec   : > { %2119 = vmatpush3.xpose.msk.msra.mxu0 %vm816_vm3, %v1546_v28  ;;  %1388 = vadd.xlane.f32.xlu0 %v1387_v30 }
 0x5ed   : > { %2120 = vmatprep.mubr.msk.f32.mxu0 %vm2519_vm0, %v2520_v1  ;;  %2128 = vmatprep.subr.mxu0 %v2520_v1 }
 0x5ef   : > { %2121 = vmatmul.mubr.msk.f32.vlgmr.msra.gmra.mrb[12].mxu0 %vm816_vm3, %v1544_v31 }
 0x5f0   : > { %2130 = vmatprep.mubr.msk.f32.mxu0 %vm2519_vm0, %v2520_v1 }
 0x602   : > { %1632 = vrot.lane.b32.xlu0 %v2921_v29, %s2523_s4  ;;  %s3017_s4 = scalar_lea.hbm %s3144_s1, %s2004_s9 }
 0x679   : > { %v1389_v32 = vpop.xlane.xlu0 %1388 }
 0x67a   : > { %2250 = vrcp.f32 %v1389_v32 }
 0x67d   : > { %v1633_v37 = vpop.permute.xlu0 %1632 }
 0x684   : > { %v2251_v33 = vpop.eup %2250 }
 0x6be   : > { %v1462_v34 = vpop.f32.mrb[10].mxu0 }
 0x6bf   : > { %v1467_v35 = vmul.f32 %v2251_v33, %v1462_v34  ;;  %v2112_v36 = vpop.f32.mrb[11].mxu0 }
 0x6c1   : > { %2116 = vmatmul.mubr.msk.f32.vlgmr.msra.gmra.mrb[10].mxu1 %vm816_vm3, %v1467_v35 }
 0x6c2   : > { %2124 = vmatpush3.msra.mxu1 %v1633_v37  ;;  %v1617_v38 = vpop.f32.mrb[12].mxu0  ;;  %2125 = vmatprep.mubr.msk.f32.mxu1 %vm2519_vm0, %v2520_v1  ;;  %v1710_v1 = vld [vmem:[%s3141_s18 + $0x18] sm:$0xff] }
 0x6c3   : > { %v1621_v29 = vmul.f32 0.35355338, %v1617_v38  ;;  %v2122_v40 = vpop.f32.mrb[13].mxu0  ;;  %2129 = vmatpush3.msra.mxu0 %v1710_v1 }
 0x6c5   : > { %v1622_v41 = vadd.f32 %v1621_v29, %v2938_v39 }
 0x6c7   : > { %v1623_v42 = vsel %vm816_vm3, %v1622_v41, -inf }
 0x6c8   : > { %1624 = vmax.xlane.f32.xlu1 %v1623_v42 }
 0x755   : > { %v1625_v43 = vpop.xlane.xlu1 %1624 }
 0x756   : > { %v1626_v44 = vsub.f32 %v1622_v41, %v1625_v43 }
 0x758   : > { %v1627_v45 = vmul.f32 1.442695, %v1626_v44 }
 0x75a   : > { %2252 = vpow2.f32 %v1627_v45 }
 0x764   : > { %v2253_v46 = vpop.eup %2252 }
 0x765   : > { %2126 = vmatmul.mubr.msk.f32.vlgmr.msra.gmra.mrb[12].mxu1 %vm816_vm3, %v2253_v46  ;;  %v1629_v47 = vsel %vm816_vm3, %v2253_v46, 0.0 }
 0x766   : > { %1630 = vadd.xlane.f32.xlu1 %v1629_v47 }
 0x794   : > { %v1538_v39 = vpop.f32.mrb[10].mxu1 }
 0x795   : > { %v1542_v48 = vadd.f32 %v1538_v39, %v1298_v16  ;;  %v2117_v49 = vpop.f32.mrb[11].mxu1 }
 0x7f3   : > { %v1631_v50 = vpop.xlane.xlu1 %1630 }
 0x7f4   : > { %2254 = vrcp.f32 %v1631_v50 }
 0x7fe   : > { %v2255_v51 = vpop.eup %2254 }
 0x838   : > { %v1704_v52 = vpop.f32.mrb[12].mxu1 }
 0x839   : > { %v1709_v53 = vmul.f32 %v2255_v51, %v1704_v52  ;;  %v2127_v54 = vpop.f32.mrb[13].mxu1 }
 0x83b   : > { %2131 = vmatmul.mubr.msk.f32.vlgmr.msra.gmra.mrb[14].mxu0 %vm816_vm3, %v1709_v53 }
 0x90e   : > { %v1780_v55 = vpop.f32.mrb[14].mxu0 }
 0x90f   : > { %v1784_v57 = vadd.f32 %v1780_v55, %v1542_v48  ;;  %v2132_v58 = vpop.f32.mrb[15].mxu0 }
 0x911   : > { %v1792_v59 = vadd.f32 %v2002_v56, %v1784_v57 }
 0x913   : > { %1793 = vst.msk [vmem:[%s554_s28] sm:$0xff] %vm573_vm2, %v1792_v59 }
 0x914   : > { %2443 = shalt.err (!%p2440_p2)
}
 0x915   : > { %s2444_s26 = scalar_lea.hbm %s3017_s4, 128  ;;  %s2448_s21 = scalar_lea.hbm %s3144_s1, 256 }
 0x916   : > { %p2445_p8 = scmp.ne.s32.totalorder %s3017_s4, %s2444_s26  ;;  %p2449_p1 = scmp.lt.u32.totalorder %s3017_s4, %s3144_s1 }
 0x917   : > { %p2450_p6 = scmp.lt.u32.totalorder %s2448_s21, %s2444_s26  ;;  %p2452_p0 = scmp.lt.u32.totalorder %s2444_s26, %s3017_s4 }
 0x918   : > { %p2446_p11 = pnand %p2445_p8, %p3145_p4 }
 0x919   : > { %p2451_p10 = por %p2450_p6, %p2449_p1 }
 0x91a   : > { %p2447_p12 = pneg %p2446_p11 }
 0x91b   : > { %p2453_p9 = por %p2452_p0, %p2451_p10 }
 0x91d   : > { %p2454_p13 = pnand %p2453_p9, %p2447_p12 }
 0x91f   : > { %2457 = shalt.err (!%p2454_p13)
}
 0x920   : > { %2163 = dma.vmem_to_hbm [thread:$0]  (%p3145_p4), %s3019_s11, 128, %s3017_s4, %s1795_s14  }
 0x921 PF: > { %s3146_s20 = sld [smem:[#allocation19_spill]]  ;;  %s3147_s3 = sld [smem:[#allocation21_spill]] }
 0x922   : > { %s3148_s24 = sld [smem:[#allocation20_spill]] }
 0x927   : > { %s1820_s9 = sand.u32 1, %s3146_s20   ;;  %p3149_p7 = scmp.ne.s32.totalorder %s3147_s3, 0 }
 0x928   : > { %p3150_p3 = scmp.ge.s32.totalorder %s3148_s24, 2  ;;  %s1821_s28 = scalar_lea.sflag [#allocation4], %s1820_s9 }
 0x92a   : > { %p2186_p5 = pnand %p3150_p3, %p3149_p7 }
 0x92c   : > { %2491 = dma.done.wait (!%p2186_p5), %s1821_s28, 128  }
 0x92d   : > { %2493 = vsyncadd (!%p2186_p5), %s1821_s28, 4294967168  ;;  %s3151_s24 = sld [smem:[#allocation22_spill]]  ;;  %s3152_s19 = sld [smem:[#allocation23_spill]] }
 0x92e   : > { %s3153_s21 = smov %s2500_s22  ;;  %s3154_s22 = smov %s2504_s23 }
 0x933   : > { %p30_p2 = scmp.ge.s32.totalorder %s3151_s24, 4   ;;  %s3155_s23 = smov %s3152_s19 }
 0x935   :  { %32 = sbr.rel (!%p30_p2) target bundleno = 17 (0x11), region = 152 }
 0x93c   :  { %1826 = vsyncpa [#allocation3], 1 }
 0x93d   :  { %1828 = vsyncpa [#allocation3 + $0x1], 1 }
 0x93e   :  { %1829 = vsyncpa [#allocation6], 1 }
 0x93f   :  { %1831 = vsyncpa [#allocation6 + $0x1], 1 }
 0x940   :  { %1832 = vsyncpa [#allocation9], 1 }
 0x941   :  { %1833 = vsyncpa [#allocation12], 1 }
 0x942   :  { %1834 = vsyncpa [#allocation4], 1 }
 0x943   :  { %1836 = vsyncpa [#allocation4 + $0x1], 1 }

</bundles_post_ra>
